<compile_context>
chip_gen: v7x
topology: tpu7x:2x2x1
jax: 0.10.0
libtpu: 0.0.40
codegen_flags: <defaults>
</compile_context>

<pallas_src>
import functools

import jax
import jax.numpy as jnp
from jax.experimental import pallas as pl
from jax.experimental.pallas import tpu as pltpu


def _round_up(x: int, m: int) -> int:
    return ((x + m - 1) // m) * m


def _dwsep_kernel(wf_ref, xc_ref, xl_ref, xr_ref, o_ref, xw_ref, *,
                  K, dilation, l_tile, pad_l, pad_r, halo, seq_len, rem):
    """One (batch, L-tile) step of the fused depthwise+pointwise conv1d.

    wf_ref : (K, C_out, C_in)      fused weights W_k[o,c] = w_pw[o,c]*w_dw[c,k]
    xc_ref : (1, C_in, l_tile)     current L tile of the (unpadded) input
    xl_ref : (1, C_in, halo)       previous halo block (left context source)
    xr_ref : (1, C_in, halo)       next halo block (right context source)
    o_ref  : (1, C_out, l_tile)    output tile
    xw_ref : (C_in, halo + l_tile + pad_r)  scratch working window
    """
    l = pl.program_id(1)
    n_l = pl.num_programs(1)
    m = halo  # left margin in the window: 128-aligned and >= pad_l

    # ---- build the working window: [left ctx | current tile | right ctx] ----
    # Lane-aligned bulk copy of the current tile (overlaps the next tile's DMA
    # under the BlockSpec pipeline).
    xw_ref[:, m:m + l_tile] = xc_ref[0].astype(xw_ref.dtype)

    if rem != l_tile:
        # Static: L % l_tile != 0.  The last tile's columns >= rem were never
        # DMA'd (Pallas clips the copy, the tail is stale VMEM); zero them so
        # the right-edge taps of still-valid outputs read 'same' padding zeros.
        @pl.when(l == n_l - 1)
        def _():
            xw_ref[:, m + rem:m + l_tile] = jnp.zeros(
                (xw_ref.shape[0], l_tile - rem), xw_ref.dtype)

    if pad_l:
        # Left context: last pad_l columns of the previous halo block, or zeros
        # on the first tile (virtual left padding).
        lh = xl_ref[0, :, halo - pad_l:].astype(xw_ref.dtype)
        xw_ref[:, m - pad_l:m] = jnp.where(l > 0, lh, jnp.zeros_like(lh))

    if pad_r:
        # Right context: first pad_r columns of the next halo block, zeroed for
        # absolute columns >= L (virtual right padding; also neutralizes the
        # clamped halo block index on the last tile).
        rh = xr_ref[0, :, :pad_r].astype(xw_ref.dtype)
        cols = (l + 1) * l_tile + jax.lax.broadcasted_iota(
            jnp.int32, (1, pad_r), 1)
        xw_ref[:, m + l_tile:m + l_tile + pad_r] = jnp.where(
            cols < seq_len, rh, jnp.zeros_like(rh))

    # ---- K dilated taps as MXU matmuls, f32 accumulation --------------------
    base = m - pad_l
    acc = jnp.dot(wf_ref[0], xw_ref[:, base:base + l_tile],
                  preferred_element_type=jnp.float32)
    for k in range(1, K):                         # K is small; static unroll
        off = base + k * dilation                 # static offset
        acc = acc + jnp.dot(wf_ref[k], xw_ref[:, off:off + l_tile],
                            preferred_element_type=jnp.float32)

    o_ref[0] = acc.astype(o_ref.dtype)


def depthwise_separable_conv1d(x, w_dw, w_pw, *, dilation=2, l_tile=1024,
                               mxu_dtype=None, input_buffers=2):
    """x: (N, C_in, L); w_dw: (C_in, K); w_pw: (C_out, C_in) -> (N, C_out, L).

    stride is 1 (PyTorch requires stride=1 with padding='same').
    `mxu_dtype=jnp.bfloat16` is an opt-in lower-precision operand path
    (accumulation stays f32); expect ~1e-2-level deviations vs. f32.
    """
    N, C_in, L = x.shape
    C_out = w_pw.shape[0]
    K = w_dw.shape[1]

    # PyTorch padding='same' (stride=1): total = dilation*(K-1),
    # left = total // 2, right = total - left.
    total_pad = dilation * (K - 1)
    pad_l = total_pad // 2
    pad_r = total_pad - pad_l

    # Halo block width: 128-lane aligned, covers the largest one-sided context.
    halo = _round_up(max(pad_l, pad_r, 1), 128)
    # L tile: multiple of `halo` (hence 128) -> lane-dense output stores and
    # exact block-index math for the halo views; clamp to the rounded-up L.
    l_tile = max(halo, min(_round_up(l_tile, halo), _round_up(L, halo)))
    nl = pl.cdiv(L, l_tile)
    rem = L - (nl - 1) * l_tile            # static width of the last tile
    ratio = l_tile // halo
    n_hblocks = pl.cdiv(L, halo)           # halo-granularity block count

    orig_dtype = x.dtype
    if mxu_dtype is not None:
        x = x.astype(mxu_dtype)            # DMA narrow operands from HBM
    compute_dtype = x.dtype

    # Fold depthwise weights into the pointwise matmul: K small (C_out, C_in)
    # matrices so the entire MAC runs on the MXU.
    w_fused = (w_pw[None, :, :] *
               jnp.transpose(w_dw)[:, None, :]).astype(compute_dtype)

    kernel = functools.partial(
        _dwsep_kernel, K=K, dilation=dilation, l_tile=l_tile,
        pad_l=pad_l, pad_r=pad_r, halo=halo, seq_len=L, rem=rem)

    # Explicit VMEM budget (double-buffered blocks + scratch + f32 acc).
    it = jnp.dtype(compute_dtype).itemsize
    ot = jnp.dtype(orig_dtype).itemsize
    est = (2 * K * C_out * C_in * it                 # fused weights
           + 2 * C_in * l_tile * it                  # current x tile
           + 2 * 2 * C_in * halo * it                # two halo blocks
           + 2 * C_out * l_tile * ot                 # output tile
           + C_in * (halo + l_tile + pad_r) * it     # scratch window
           + C_out * l_tile * 4)                     # f32 accumulator
    vmem_limit = int(min(max(2 * est, 32 * 1024 * 1024), 100 * 1024 * 1024))

    x_spec_kwargs = {}
    if input_buffers != 2:
        # Optional deeper pipelining of the main x stream (sweepable).
        x_spec_kwargs = dict(pipeline_mode=pl.Buffered(input_buffers))
    x_spec = pl.BlockSpec((1, C_in, l_tile), lambda n, l: (n, 0, l),
                          **x_spec_kwargs)

    return pl.pallas_call(
        kernel,
        out_shape=jax.ShapeDtypeStruct((N, C_out, L), orig_dtype),
        grid_spec=pltpu.PrefetchScalarGridSpec(
            num_scalar_prefetch=0,
            grid=(N, nl),
            in_specs=[
                # Fused weights: constant block index -> stays resident.
                pl.BlockSpec((K, C_out, C_in), lambda n, l: (0, 0, 0)),
                # Current L tile of the unpadded input.
                x_spec,
                # Previous halo block (left context), clamped at the left edge.
                pl.BlockSpec((1, C_in, halo),
                             lambda n, l: (n, 0, jnp.maximum(l * ratio - 1, 0))),
                # Next halo block (right context), clamped at the right edge.
                pl.BlockSpec((1, C_in, halo),
                             lambda n, l: (n, 0, jnp.minimum((l + 1) * ratio,
                                                             n_hblocks - 1))),
            ],
            out_specs=pl.BlockSpec((1, C_out, l_tile), lambda n, l: (n, 0, l)),
            scratch_shapes=[
                pltpu.VMEM((C_in, halo + l_tile + pad_r), compute_dtype)],
        ),
        compiler_params=pltpu.CompilerParams(
            dimension_semantics=("parallel", "parallel"),
            vmem_limit_bytes=vmem_limit),
    )(w_fused, x, x, x)


def _reference(x, w_dw, w_pw, *, dilation=2):
    """Plain-JAX reference with identical semantics (sanity check)."""
    N, C_in, L = x.shape
    K = w_dw.shape[1]
    total_pad = dilation * (K - 1)
    pad_l = total_pad // 2
    x_pad = jnp.pad(x, ((0, 0), (0, 0), (pad_l, total_pad - pad_l)))
    dw = jnp.zeros((N, C_in, L), jnp.float32)
    for k in range(K):
        s = k * dilation
        dw = dw + w_dw[None, :, k:k + 1] * x_pad[:, :, s:s + L]
    return jnp.einsum("oc,ncl->nol", w_pw, dw)


if __name__ == "__main__":
    key = jax.random.PRNGKey(0)

    def check(N, C_in, C_out, L, K, dilation, l_tile, case_key,
              mxu_dtype=None, atol=1e-5, rtol=1e-5):
        kx, kdw, kpw = jax.random.split(case_key, 3)
        x = jax.random.normal(kx, (N, C_in, L), dtype=jnp.float32)
        # nn.Conv1d depthwise weight is (C_in, 1, K); pointwise is (C_out, C_in, 1).
        w_dw = jax.random.normal(kdw, (C_in, K), dtype=jnp.float32) * 0.1
        w_pw = jax.random.normal(kpw, (C_out, C_in), dtype=jnp.float32) * 0.1
        out = depthwise_separable_conv1d(x, w_dw, w_pw, dilation=dilation,
                                         l_tile=l_tile, mxu_dtype=mxu_dtype)
        out = jax.block_until_ready(out)
        ref = _reference(x, w_dw, w_pw, dilation=dilation)
        assert out.shape == (N, C_out, L)
        assert jnp.allclose(out, ref, atol=atol, rtol=rtol), (
            f"mismatch N={N} C_in={C_in} C_out={C_out} L={L} K={K} "
            f"d={dilation} l_tile={l_tile} mxu_dtype={mxu_dtype}")

    k1, k2, k3, k4 = jax.random.split(key, 4)
    # Small shape matching the module's forward (single, partial L tile).
    check(2, 4, 8, 16, 3, 2, 1024, k1)
    # Multi-tile grid with a ragged last tile: exercises both halos, the
    # left/right edge masks and the stale-tail zeroing.
    check(2, 4, 8, 300, 3, 3, 128, k2)
    # Asymmetric 'same' padding (odd total pad) crossing a tile boundary.
    check(1, 8, 16, 200, 2, 3, 128, k3)
    # Documented opt-in bf16 MXU-operand path (looser tolerance vs f32 module).
    check(2, 4, 8, 16, 3, 2, 1024, k4, mxu_dtype=jnp.bfloat16,
          atol=2e-2, rtol=2e-2)

    print("KERNEL_OK")
</pallas_src>

<mosaic_0001>
module attributes {stable_mosaic.version = 11 : i64} {
  func.func @_dwsep_kernel(%arg0: i32, %arg1: i32, %arg2: memref<3x8x4xf32, #tpu.memory_space<vmem>>, %arg3: memref<1x4x128xf32, #tpu.memory_space<vmem>>, %arg4: memref<1x4x128xf32, #tpu.memory_space<vmem>>, %arg5: memref<1x4x128xf32, #tpu.memory_space<vmem>>, %arg6: memref<1x8x128xf32, #tpu.memory_space<vmem>>, %arg7: memref<4x258xf32, #tpu.memory_space<vmem>>) attributes {dimension_semantics = [#tpu.dimension_semantics<parallel>, #tpu.dimension_semantics<parallel>], iteration_bounds = array<i64: 2, 1>, scalar_prefetch = 0 : i64, scratch_operands = 1 : i64, tpu.core_type = #tpu.core_type<tc>, window_params = [{pipeline_mode = #tpu.pipeline_mode<synchronous>, transform_indices = @transform_0, window_bounds = array<i64: 3, 8, 4>}, {transform_indices = @transform_1, window_bounds = array<i64: 1, 4, 128>}, {transform_indices = @transform_2, window_bounds = array<i64: 1, 4, 128>}, {transform_indices = @transform_3, window_bounds = array<i64: 1, 4, 128>}, {transform_indices = @transform_4, window_bounds = array<i64: 1, 8, 128>}]} {
    %c0 = arith.constant 0 : index
    %c0_0 = arith.constant 0 : index
    %c0_1 = arith.constant 0 : index
    %0 = vector.load %arg3[%c0, %c0_0, %c0_1] : memref<1x4x128xf32, #tpu.memory_space<vmem>>, vector<1x4x128xf32>
    %1 = vector.shape_cast %0 : vector<1x4x128xf32> to vector<4x128xf32>
    %c0_2 = arith.constant 0 : index
    %c128 = arith.constant 128 : index
    %2 = vector.load %arg7[%c0_2, %c128] : memref<4x258xf32, #tpu.memory_space<vmem>>, vector<4x128xf32>
    tpu.vector_store %arg7[%c0_2, %c128], %1 {strides = array<i32>} : memref<4x258xf32, #tpu.memory_space<vmem>>, vector<4x128xf32>,
    %c0_i32 = arith.constant 0 : i32
    %3 = arith.cmpi eq, %arg1, %c0_i32 : i32
    %4 = arith.extui %3 : i1 to i32
    %c0_i32_3 = arith.constant 0 : i32
    %5 = arith.cmpi ne, %4, %c0_i32_3 : i32
    scf.if %5 {
      %cst_32 = arith.constant 0.000000e+00 : f32
      %43 = vector.broadcast %cst_32 : f32 to vector<4x112xf32>
      %c0_33 = arith.constant 0 : index
      %c144 = arith.constant 144 : index
      %44 = vector.load %arg7[%c0_33, %c144] : memref<4x258xf32, #tpu.memory_space<vmem>>, vector<4x112xf32>
      tpu.vector_store %arg7[%c0_33, %c144], %43 {strides = array<i32>} : memref<4x258xf32, #tpu.memory_space<vmem>>, vector<4x112xf32>,
    } else {
    }
    %c0_4 = arith.constant 0 : index
    %c0_5 = arith.constant 0 : index
    %c126 = arith.constant 126 : index
    %6 = vector.load %arg4[%c0_4, %c0_5, %c126] : memref<1x4x128xf32, #tpu.memory_space<vmem>>, vector<1x4x2xf32>
    %7 = vector.shape_cast %6 : vector<1x4x2xf32> to vector<4x2xf32>
    %c0_i32_6 = arith.constant 0 : i32
    %8 = arith.cmpi sgt, %arg1, %c0_i32_6 : i32
    %cst = arith.constant 0.000000e+00 : f32
    %9 = vector.broadcast %cst : f32 to vector<4x2xf32>
    %10 = arith.select %8, %7, %9 : vector<4x2xf32>
    %c0_7 = arith.constant 0 : index
    %c126_8 = arith.constant 126 : index
    %11 = vector.load %arg7[%c0_7, %c126_8] : memref<4x258xf32, #tpu.memory_space<vmem>>, vector<4x2xf32>
    tpu.vector_store %arg7[%c0_7, %c126_8], %10 {strides = array<i32>} : memref<4x258xf32, #tpu.memory_space<vmem>>, vector<4x2xf32>,
    %c0_9 = arith.constant 0 : index
    %c0_10 = arith.constant 0 : index
    %c0_11 = arith.constant 0 : index
    %12 = vector.load %arg5[%c0_9, %c0_10, %c0_11] : memref<1x4x128xf32, #tpu.memory_space<vmem>>, vector<1x4x2xf32>
    %13 = vector.shape_cast %12 : vector<1x4x2xf32> to vector<4x2xf32>
    %c1_i32 = arith.constant 1 : i32
    %14 = arith.addi %arg1, %c1_i32 : i32
    %c128_i32 = arith.constant 128 : i32
    %15 = arith.muli %14, %c128_i32 : i32
    %16 = tpu.iota {dimensions = array<i32: 1>} : vector<1x2xi32>
    %17 = vector.broadcast %15 : i32 to vector<1x2xi32>
    %18 = arith.addi %17, %16 : vector<1x2xi32>
    %c16_i32 = arith.constant 16 : i32
    %19 = vector.broadcast %c16_i32 : i32 to vector<1x2xi32>
    %20 = arith.cmpi slt, %18, %19 : vector<1x2xi32>
    %cst_12 = arith.constant 0.000000e+00 : f32
    %21 = vector.broadcast %cst_12 : f32 to vector<4x2xf32>
    %22 = vector.shape_cast %20 : vector<1x2xi1> to vector<1x2xi1>
    %23 = vector.broadcast %22 : vector<1x2xi1> to vector<4x2xi1>
    %24 = arith.select %23, %13, %21 : vector<4x2xi1>, vector<4x2xf32>
    %c0_13 = arith.constant 0 : index
    %c256 = arith.constant 256 : index
    %25 = vector.load %arg7[%c0_13, %c256] : memref<4x258xf32, #tpu.memory_space<vmem>>, vector<4x2xf32>
    tpu.vector_store %arg7[%c0_13, %c256], %24 {strides = array<i32>} : memref<4x258xf32, #tpu.memory_space<vmem>>, vector<4x2xf32>,
    %c0_14 = arith.constant 0 : index
    %c0_15 = arith.constant 0 : index
    %c0_16 = arith.constant 0 : index
    %26 = vector.load %arg2[%c0_14, %c0_15, %c0_16] : memref<3x8x4xf32, #tpu.memory_space<vmem>>, vector<1x8x4xf32>
    %27 = vector.shape_cast %26 : vector<1x8x4xf32> to vector<8x4xf32>
    %c0_17 = arith.constant 0 : index
    %c126_18 = arith.constant 126 : index
    %28 = vector.load %arg7[%c0_17, %c126_18] : memref<4x258xf32, #tpu.memory_space<vmem>>, vector<4x128xf32>
    %cst_19 = arith.constant dense<0.000000e+00> : vector<8x128xf32>
    %29 = tpu.matmul %27, %28, %cst_19 {dimension_numbers = #tpu.dot_dimension_numbers<[1], [0], [0], [1], [0, 0, 1, 1], [], []>} : vector<8x4xf32>, vector<4x128xf32>, vector<8x128xf32> -> vector<8x128xf32>
    %c1 = arith.constant 1 : index
    %c0_20 = arith.constant 0 : index
    %c0_21 = arith.constant 0 : index
    %30 = vector.load %arg2[%c1, %c0_20, %c0_21] : memref<3x8x4xf32, #tpu.memory_space<vmem>>, vector<1x8x4xf32>
    %31 = vector.shape_cast %30 : vector<1x8x4xf32> to vector<8x4xf32>
    %c0_22 = arith.constant 0 : index
    %c128_23 = arith.constant 128 : index
    %32 = vector.load %arg7[%c0_22, %c128_23] : memref<4x258xf32, #tpu.memory_space<vmem>>, vector<4x128xf32>
    %cst_24 = arith.constant dense<0.000000e+00> : vector<8x128xf32>
    %33 = tpu.matmul %31, %32, %cst_24 {dimension_numbers = #tpu.dot_dimension_numbers<[1], [0], [0], [1], [0, 0, 1, 1], [], []>} : vector<8x4xf32>, vector<4x128xf32>, vector<8x128xf32> -> vector<8x128xf32>
    %34 = arith.addf %29, %33 : vector<8x128xf32>
    %c2 = arith.constant 2 : index
    %c0_25 = arith.constant 0 : index
    %c0_26 = arith.constant 0 : index
    %35 = vector.load %arg2[%c2, %c0_25, %c0_26] : memref<3x8x4xf32, #tpu.memory_space<vmem>>, vector<1x8x4xf32>
    %36 = vector.shape_cast %35 : vector<1x8x4xf32> to vector<8x4xf32>
    %c0_27 = arith.constant 0 : index
    %c130 = arith.constant 130 : index
    %37 = vector.load %arg7[%c0_27, %c130] : memref<4x258xf32, #tpu.memory_space<vmem>>, vector<4x128xf32>
    %cst_28 = arith.constant dense<0.000000e+00> : vector<8x128xf32>
    %38 = tpu.matmul %36, %37, %cst_28 {dimension_numbers = #tpu.dot_dimension_numbers<[1], [0], [0], [1], [0, 0, 1, 1], [], []>} : vector<8x4xf32>, vector<4x128xf32>, vector<8x128xf32> -> vector<8x128xf32>
    %39 = arith.addf %34, %38 : vector<8x128xf32>
    %c0_29 = arith.constant 0 : index
    %c0_30 = arith.constant 0 : index
    %c0_31 = arith.constant 0 : index
    %40 = vector.load %arg6[%c0_29, %c0_30, %c0_31] : memref<1x8x128xf32, #tpu.memory_space<vmem>>, vector<1x8x128xf32>
    %41 = vector.shape_cast %40 : vector<1x8x128xf32> to vector<8x128xf32>
    %42 = vector.shape_cast %39 : vector<8x128xf32> to vector<1x8x128xf32>
    tpu.vector_store %arg6[%c0_29, %c0_30, %c0_31], %42 {strides = array<i32>} : memref<1x8x128xf32, #tpu.memory_space<vmem>>, vector<1x8x128xf32>,
    return
  }
  func.func @transform_0(%arg0: i32, %arg1: i32) -> (i32, i32, i32) {
    %c0_i32 = arith.constant 0 : i32
    %c0_i32_0 = arith.constant 0 : i32
    %c0_i32_1 = arith.constant 0 : i32
    %c0_i32_2 = arith.constant 0 : i32
    return %c0_i32, %c0_i32_0, %c0_i32_1 : i32, i32, i32
  }
  func.func @transform_1(%arg0: i32, %arg1: i32) -> (i32, i32, i32) {
    %c0_i32 = arith.constant 0 : i32
    %c0_i32_0 = arith.constant 0 : i32
    return %arg0, %c0_i32, %arg1 : i32, i32, i32
  }
  func.func @transform_2(%arg0: i32, %arg1: i32) -> (i32, i32, i32) {
    %c1_i32 = arith.constant 1 : i32
    %0 = arith.muli %arg1, %c1_i32 : i32
    %c1_i32_0 = arith.constant 1 : i32
    %1 = arith.subi %0, %c1_i32_0 : i32
    %c0_i32 = arith.constant 0 : i32
    %2 = arith.maxsi %1, %c0_i32 : i32
    %c0_i32_1 = arith.constant 0 : i32
    %c0_i32_2 = arith.constant 0 : i32
    return %arg0, %c0_i32_1, %2 : i32, i32, i32
  }
  func.func @transform_3(%arg0: i32, %arg1: i32) -> (i32, i32, i32) {
    %c1_i32 = arith.constant 1 : i32
    %0 = arith.addi %arg1, %c1_i32 : i32
    %c1_i32_0 = arith.constant 1 : i32
    %1 = arith.muli %0, %c1_i32_0 : i32
    %c0_i32 = arith.constant 0 : i32
    %2 = arith.minsi %1, %c0_i32 : i32
    %c0_i32_1 = arith.constant 0 : i32
    %c0_i32_2 = arith.constant 0 : i32
    return %arg0, %c0_i32_1, %2 : i32, i32, i32
  }
  func.func @transform_4(%arg0: i32, %arg1: i32) -> (i32, i32, i32) {
    %c0_i32 = arith.constant 0 : i32
    %c0_i32_0 = arith.constant 0 : i32
    return %arg0, %c0_i32, %arg1 : i32, i32, i32
  }
}

</mosaic_0001>

<bundles_post_ra>
// kernel: tpu_custom_call.1
= control target key start
LH: loop header
LB: loop body
LE: loop exit
PB: predicated region body
PF: predicated region fallthrough
CT: control target
= control target key end

     0   :  { %9 = vsyncpa [#allocation4], 0  ;;  %s1061_s0 = inlined_call_operand.vmem [shape: f32[3,8,4], index: 0, kind: input, shape index: {}]   ;;  %s1062_s1 = inlined_call_operand.vmem [shape: f32[2,4,16], index: 1, kind: input, shape index: {}]   ;;  %s1063_s2 = inlined_call_operand.vmem [shape: f32[2,4,16], index: 2, kind: input, shape index: {}]   ;;  %s1064_s3 = inlined_call_operand.vmem [shape: f32[2,4,16], index: 3, kind: input, shape index: {}]   ;;  %s1065_s4 = inlined_call_operand.hbm [shape: f32[2,8,16], index: 4, kind: output, shape index: {}]  }
   0x1   :  { %11 = vsyncpa [#allocation4 + $0x1], 0  ;;  %s931_s15 = smov 0   ;;  %s933_s16 = smov 0  }
   0x2   :  { %s935_s17 = smov 0   ;;  %s937_s18 = smov 0  }
   0x3   :  { %s939_s19 = smov 0   ;;  %s941_s20 = smov 0  }
   0x4 LB: > { %s715_s2 = sadd.s32 4294967295, %s899_s20   ;;  %s716_s3 = sadd.s32 4294967294, %s899_s20   ;;  %s899_s20 = sphi %s941_s20, %s17_s20   ;;  %s895_s19 = sphi %s939_s19, %s1072_s19   ;;  %s891_s18 = sphi %s937_s18, %s1071_s18   ;;  %s887_s17 = sphi %s935_s17, %s1070_s17   ;;  %s883_s16 = sphi %s933_s16, %s1069_s16   ;;  %s879_s15 = sphi %s931_s15, %s1068_s15  }
   0x5   : > { %s29_s21 = sadd.s32 1, %s895_s19  ;;  %s155_s22 = sadd.s32 1, %s887_s17 }
   0x6   : > { %p31_p0 = scmp.ge.s32.totalorder %s29_s21, 2  ;;  %p165_p1 = scmp.ne.s32.totalorder %s887_s17, %s883_s16 }
   0x7   : > { %p166_p2 = scmp.eq.s32.totalorder %s715_s2, 1  ;;  %p171_p3 = scmp.ne.s32.totalorder %s883_s16, %s879_s15 }
   0x8   : > { %s1074_s21 = smov (%p31_p0, %s29_s21), 0  ;;  %p172_p5 = scmp.eq.s32.totalorder %s716_s3, 1 }
   0x9   : > { %p971_p4 = por %p166_p2, %p165_p1  ;;  %s150_s24 = ssub.s32 %s895_s19, %s1074_s21 }
   0xa   : > { %p719_p6 = scmp.ge.s32.totalorder %s899_s20, 1  ;;  %p153_p7 = scmp.eq.s32.totalorder %s150_s24, 0 }
   0xb   : > { %p978_p8 = por %p172_p5, %p171_p3  ;;  %p235_p9 = scmp.lt.s32.totalorder %s899_s20, 3 }
   0xc   : > { %s984_s26 = scalar_select %p153_p7, %s887_s17, %s155_s22  }
   0xd   : > { %p236_p10 = pnand %p719_p6, %p235_p9 }
   0xe   : > { %p283_p11 = scmp.lt.s32.totalorder (!%p236_p10), %s891_s18, 1  ;;  %vm343_vm0 = vcmask (!%p236_p10), 11264   ;;  %vm330_vm1 = vcmask (!%p236_p10), 1044464   ;;  %v901_v0 = vmov (!%p236_p10), 0.0   ;;  %vm322_vm2 = vcmask (!%p236_p10), 1043584   ;;  %v724_v2 = vld [vmem:[%s1061_s0 + $0x8] sm:$0xff] (!%p236_p10) }
   0xf   : > { %239 = sbr.rel (%p236_p10) target bundleno = 394 (0x18a), region = 36  ;;  %344 = vst.msk [vmem:[#allocation2 + $0x8] sm:$0xf] (!%p236_p10), %vm343_vm0, %v901_v0  ;;  %747 = vmatprep.subr.mxu0 (!%p236_p10), %v901_v0  ;;  %742 = vmatprep.subr.mxu1 (!%p236_p10), %v901_v0  ;;  %vm902_vm3 = vmmov (!%p236_p10), 0   ;;  %s903_s8 = smov (!%p236_p10), 126   ;;  %vm354_vm4 = vcmask (!%p236_p10), 1043456  }
  0x10   : > { %331 = vst.msk [vmem:[#allocation2] sm:$0xf] (!%p236_p10), %vm330_vm1, %v901_v0  ;;  %749 = vmatprep.mubr.msk.f32.mxu0 (!%p236_p10), %vm902_vm3, %v901_v0  ;;  %744 = vmatprep.mubr.msk.f32.mxu1 (!%p236_p10), %vm902_vm3, %v901_v0  ;;  %s904_s9 = smov (!%p236_p10), 2   ;;  %vm350_vm5 = vcmask (!%p236_p10), 31744   ;;  %vm520_vm6 = vcmask (!%p236_p10), 1031168   ;;  %vm434_vm7 = vcmask (!%p236_p10), 15360  }
  0x11   : > { %v345_v12 = vld [vmem:[%s1061_s0] sm:$0xff] (!%p236_p10)  ;;  %v729_v15 = vld [vmem:[%s1061_s0 + $0x10] sm:$0xff] (!%p236_p10)  ;;  %s280_s14 = sand.u32 (!%p236_p10), 1, %s883_s16   ;;  %s733_s3 = sshll.u32 (!%p236_p10), %s891_s18, 7 }
  0x12   : > { %s720_s2 = sshll.u32 (!%p236_p10), %s280_s14, 3  ;;  %s1014_s29 = scalar_lea.hbm (!%p236_p10), %s1065_s4, %s733_s3 }
  0x13   : > { %s282_s22 = scalar_lea.vmem (!%p236_p10), [#allocation3], %s720_s2  ;;  %s600_s30 = scalar_lea.sflag (!%p236_p10), [#allocation4], %s280_s14 }
  0x14   : > { %s614_s24 = sshll.u32 (!%p236_p10), %s282_s22, 4  ;;  %s1016_s24 = int_to_ptr.vmem [resolvable:$true] %s614_s24 }
  0x16   : > { %s284_s27 = scalar_select %p283_p11, %s891_s18, 1 }
  0x17   : > { %s905_s18 = smov [#allocation3]  }
  0x18   : > { %s721_s28 = sshll.u32 %s284_s27, 2  ;;  %s825_s6 = sshll.u32 %s905_s18, 4  ;;  %s826_s6 = int_to_ptr.vmem [resolvable:$false] %s825_s6 }
  0x19   : > { %s289_s5 = scalar_lea.vmem %s1062_s1, %s721_s28  ;;  %s827_s7 = scalar_lea.vmem %s826_s6, 256 }
  0x1a   : > { %v316_v1 = vld [vmem:[%s289_s5] sm:$0xf]  ;;  %s821_s5 = scalar_lea.vmem %s1016_s24, 128  ;;  %p828_p1 = scmp.lt.s32.totalorder %s1016_s24, %s826_s6 }
  0x1b   : > { %317 = vst [vmem:[#allocation2 + $0x4] sm:$0xf] %v316_v1  ;;  %p822_p12 = scmp.ne.s32.totalorder %s1016_s24, %s821_s5  ;;  %p829_p2 = scmp.lt.s32.totalorder %s827_s7, %s821_s5 }
  0x1c   : > { %323 = vst.msk [vmem:[#allocation2 + $0x4] sm:$0xf] %vm322_vm2, %v901_v0 }
  0x1d   : > { %p823_p13 = pnand %p822_p12, %p971_p4  ;;  %p830_p3 = por %p829_p2, %p828_p1 }
  0x1f   : > { %p824_p0 = pneg %p823_p13 }
  0x21   : > { %p831_p5 = pnand %p830_p3, %p824_p0 }
  0x23   : > { %v513_v3 = vld [vmem:[#allocation2 + $0x4] sm:$0xff] }
  0x24   : > { %v346_v4 = vld [vmem:[#allocation2] sm:$0xff]  ;;  %516 = vrot.lane.b32.xlu1 %v513_v3, %s903_s8  ;;  %v515_v6 = vcombine.high %v513_v3, %v513_v3 }
  0x25   : > { %v349_v5 = vld [vmem:[#allocation2 + $0x4] sm:$0xf]  ;;  %430 = vrot.lane.b32.xlu0 %v346_v4, %s904_s9  ;;  %v429_v7 = vcombine.high %v346_v4, %v346_v4 }
  0x26   : > { %743 = vmatpush3.msk.msra.mxu1 %vm354_vm4, %v349_v5 }
  0x27   : > { %745 = vmatmul.mubr.msk.f32.vlgmr.msra.gmra.mrb[0].mxu1 %vm350_vm5, %v724_v2 }
  0x28   : > { %518 = vrot.lane.b32.xlu1 %v515_v6, %s903_s8 }
  0x29   : > { %432 = vrot.lane.b32.xlu0 %v429_v7, %s904_s9 }
  0x96   : > { %v517_v8 = vpop.permute.xlu1 %516 }
  0x97   : > { %v431_v9 = vpop.permute.xlu0 %430 }
  0x9a   : > { %v519_v10 = vpop.permute.xlu1 %518 }
  0x9b   : > { %v433_v11 = vpop.permute.xlu0 %432  ;;  %v521_v13 = vsel %vm520_vm6, %v517_v8, %v519_v10 }
  0x9c   : > { %v435_v14 = vsel %vm434_vm7, %v431_v9, %v433_v11 }
  0x9d   : > { %748 = vmatpush3.msk.msra.mxu0 %vm354_vm4, %v435_v14 }
  0x9e   : > { %750 = vmatmul.mubr.msk.f32.vlgmr.msra.gmra.mrb[0].mxu0 %vm350_vm5, %v345_v12  ;;  %752 = vmatprep.subr.mxu0 %v901_v0 }
  0x9f   : > { %753 = vmatpush3.msk.msra.mxu0 %vm354_vm4, %v521_v13  ;;  %754 = vmatprep.mubr.msk.f32.mxu0 %vm902_vm3, %v901_v0 }
  0xa6   : > { %755 = vmatmul.mubr.msk.f32.vlgmr.msra.gmra.mrb[0].mxu0 %vm350_vm5, %v729_v15 }
  0xfa   : > { %v424_v16 = vpop.f32.mrb[0].mxu1 }
  0xfb   : > { %v746_v17 = vpop.f32.mrb[1].mxu1 }
 0x179   : > { %v593_v18 = vpop.f32.mrb[0].mxu0 }
 0x17a   : > { %v757_v19 = vadd.f32 %v593_v18, %v424_v16  ;;  %v756_v20 = vpop.f32.mrb[1].mxu0 }
 0x17c   : > { %598 = vst [vmem:[%s282_s22] sm:$0xff] %v757_v19 }
 0x17d   : > { %834 = shalt.err (!%p831_p5)
}
 0x17e   : > { %s835_s8 = scalar_lea.hbm %s1014_s29, 128  ;;  %s839_s11 = scalar_lea.hbm %s1065_s4, 256 }
 0x17f   : > { %p836_p6 = scmp.ne.s32.totalorder %s1014_s29, %s835_s8  ;;  %p840_p10 = scmp.lt.u32.totalorder %s1014_s29, %s1065_s4 }
 0x180   : > { %p841_p11 = scmp.lt.u32.totalorder %s839_s11, %s835_s8  ;;  %p843_p13 = scmp.lt.u32.totalorder %s835_s8, %s1014_s29 }
 0x181   : > { %p837_p7 = pnand %p836_p6, %p971_p4 }
 0x182   : > { %p842_p12 = por %p841_p11, %p840_p10 }
 0x183   : > { %p838_p9 = pneg %p837_p7 }
 0x184   : > { %p844_p0 = por %p843_p13, %p842_p12 }
 0x186   : > { %p845_p1 = pnand %p844_p0, %p838_p9 }
 0x188   : > { %848 = shalt.err (!%p845_p1)
}
 0x189   : > { %760 = dma.vmem_to_hbm [thread:$0]  (%p971_p4), %s1016_s24, 128, %s1014_s29, %s600_s30  }
 0x18a PF: > { %p766_p2 = scmp.ge.s32.totalorder %s899_s20, 2  ;;  %s626_s14 = sand.u32 1, %s879_s15  }
 0x18b   : > { %s627_s2 = scalar_lea.sflag [#allocation4], %s626_s14 }
 0x18c   : > { %p763_p3 = pnand %p766_p2, %p978_p8 }
 0x18e   : > { %874 = dma.done.wait (!%p763_p3), %s627_s2, 128  }
 0x18f   : > { %876 = vsyncadd (!%p763_p3), %s627_s2, 4294967168  ;;  %s17_s20 = sadd.s32 1, %s899_s20   ;;  %s1068_s15 = smov %s883_s16 }
 0x190   : > { %p14_p5 = scmp.ge.s32.totalorder %s17_s20, 4   ;;  %s1069_s16 = smov %s887_s17 }
 0x191   : > { %s1070_s17 = smov %s984_s26  ;;  %s1071_s18 = smov %s895_s19 }
 0x192   : > { %s1072_s19 = smov %s1074_s21  ;;  %16 = sbr.rel (!%p14_p5) target bundleno = 4 (0x4), region = 83 }
 0x199   :  { %632 = vsyncpa [#allocation4], 1 }
 0x19a   :  { %634 = vsyncpa [#allocation4 + $0x1], 1 }

</bundles_post_ra>
